<compile_context>
chip_gen: v7x
topology: tpu7x:2x2x1
jax: 0.10.0
libtpu: 0.0.40
codegen_flags: <defaults>
</compile_context>

<pallas_src>
import functools

import jax
import jax.numpy as jnp
from jax.experimental import pallas as pl
from jax.experimental.pallas import tpu as pltpu


# ---------------------------------------------------------------------------
# helpers
# ---------------------------------------------------------------------------
def _vmem_capacity_bytes():
    """Physical VMEM per core; conservative (v7x) default if the query fails."""
    try:
        cap = getattr(pltpu.get_tpu_info(), "vmem_capacity_bytes", None)
        if cap:
            return int(cap)
    except Exception:
        pass
    return 64 * 1024 * 1024


def _conv1d_sigmoid_gate(pooled, w_ref, b_ref, k):
    """k-tap Conv1d over the channel (sublane) axis of pooled (1, C, 1) f32,
    zero padded at the channel edges (PyTorch cross-correlation), then sigmoid.
    Implemented as k shifted adds (pltpu.roll + edge masks): no (C, C) matrix."""
    _, C, _ = pooled.shape
    pad = (k - 1) // 2
    conv = jnp.zeros_like(pooled)
    c_idx = None
    if k > 1:
        c_idx = jax.lax.broadcasted_iota(jnp.int32, pooled.shape, 1)
    for j in range(k):
        off = j - pad                       # out[c] += w[j] * pooled[c + off]
        if off == 0:
            conv = conv + w_ref[j] * pooled
        else:
            shifted = pltpu.roll(pooled, shift=(-off) % C, axis=1)
            valid = (c_idx + off >= 0) & (c_idx + off < C)
            conv = conv + w_ref[j] * jnp.where(valid, shifted, 0.0)
    return jax.nn.sigmoid(conv + b_ref[0])


# ---------------------------------------------------------------------------
# Fused single-pass kernel: pool -> conv -> sigmoid -> rescale (2x HBM traffic)
# ---------------------------------------------------------------------------
def _eca_fused_kernel(w_ref, b_ref, x_ref, o_ref, *, k, inv_hw):
    # w_ref: (k,) f32 SMEM taps; b_ref: (1,) f32 SMEM bias
    # x_ref / o_ref: (1, C, HW) blocks resident in VMEM
    pooled = jnp.sum(x_ref[...].astype(jnp.float32), axis=-1,
                     keepdims=True) * inv_hw                       # (1, C, 1)
    gate = _conv1d_sigmoid_gate(pooled, w_ref, b_ref, k)           # (1, C, 1) f32
    # Multiply in x's dtype (bf16 math for bf16 inputs, f32 for f32 inputs).
    o_ref[...] = (x_ref[...] * gate.astype(o_ref.dtype)).astype(o_ref.dtype)


# ---------------------------------------------------------------------------
# Two-pass fallback kernels (slab too large for VMEM)
# ---------------------------------------------------------------------------
def _eca_pool_kernel(x_ref, out_ref, *, hw, thw, inv_hw):
    # x_ref: (1, C, thw); out_ref: (1, C, 1) f32, resident across the HW axis.
    j = pl.program_id(1)

    @pl.when(j == 0)
    def _():
        out_ref[...] = jnp.zeros_like(out_ref)

    x = x_ref[...].astype(jnp.float32)
    if hw % thw != 0:                       # ragged last block: mask padded lanes
        lane = jax.lax.broadcasted_iota(jnp.int32, x.shape, 2)
        x = jnp.where(j * thw + lane < hw, x, 0.0)
    out_ref[...] += jnp.sum(x, axis=-1, keepdims=True)

    @pl.when(j == pl.num_programs(1) - 1)
    def _():
        out_ref[...] *= inv_hw


def _eca_scale_kernel(x_ref, g_ref, o_ref):
    # x_ref/o_ref: (1, C, thw); g_ref: (1, C, 1) in x's dtype.
    o_ref[...] = (x_ref[...] * g_ref[...]).astype(o_ref.dtype)


# ---------------------------------------------------------------------------
# Wrapper
# ---------------------------------------------------------------------------
def eca_attention(x, conv_w, conv_b, *, force_two_pass=False):
    """ECAAttention forward.

    x:      (B, C, H, W) float array (f32 or bf16).
    conv_w: PyTorch Conv1d weight of shape (1, 1, k).
    conv_b: PyTorch Conv1d bias of shape (1,).
    Returns (B, C, H, W), same dtype as x.
    """
    B, C, H, W = x.shape
    HW = H * W
    x_flat = x.reshape(B, C, HW)
    k = int(conv_w.shape[-1])
    w = jnp.asarray(conv_w, jnp.float32).reshape(-1)               # (k,)
    bias = jnp.asarray(conv_b, jnp.float32).reshape(-1)            # (1,)
    itemsize = x.dtype.itemsize
    inv_hw = 1.0 / HW

    # Per-generation VMEM budgets: v7x 64 MiB, v5e/v6e 128 MiB.
    vmem_cap = _vmem_capacity_bytes()
    vmem_limit = int(min(vmem_cap * 3 // 4, 64 * 1024 * 1024))     # 48 MiB v7x, 64 MiB v5e/v6e
    # Per-block budget for streamed x/out blocks; ~6 blocks live at once
    # (double-buffered in + out + in-kernel widening temporaries).
    block_budget = max((vmem_limit - 8 * 1024 * 1024) // 6, 2 * 1024 * 1024)

    compiler = functools.partial(pltpu.CompilerParams, vmem_limit_bytes=vmem_limit)

    # ----------------- fused single pass (common case) --------------------
    if not force_two_pass and C * HW * itemsize <= block_budget:
        out = pl.pallas_call(
            functools.partial(_eca_fused_kernel, k=k, inv_hw=inv_hw),
            out_shape=jax.ShapeDtypeStruct((B, C, HW), x.dtype),
            grid=(B,),
            in_specs=[
                pl.BlockSpec(memory_space=pltpu.MemorySpace.SMEM),   # conv taps
                pl.BlockSpec(memory_space=pltpu.MemorySpace.SMEM),   # conv bias
                pl.BlockSpec((1, C, HW), lambda i: (i, 0, 0)),
            ],
            out_specs=pl.BlockSpec((1, C, HW), lambda i: (i, 0, 0)),
            compiler_params=compiler(dimension_semantics=("parallel",)),
        )(w, bias, x_flat)
        return out.reshape(B, C, H, W)

    # ----------------- two-pass fallback -----------------------------------
    # Lane tile along HW: multiple of 128, sized to the VMEM budget.
    if C * HW * itemsize <= block_budget or HW <= 128:
        thw = HW
    else:
        lanes = (block_budget // (C * itemsize)) // 128 * 128
        thw = int(min(max(lanes, 128), (HW // 128) * 128))
    grid = (B, pl.cdiv(HW, thw))

    # Pass 1: tiled global average pool -> (B, C, 1) f32 means.
    pooled = pl.pallas_call(
        functools.partial(_eca_pool_kernel, hw=HW, thw=thw, inv_hw=inv_hw),
        out_shape=jax.ShapeDtypeStruct((B, C, 1), jnp.float32),
        grid=grid,
        in_specs=[pl.BlockSpec((1, C, thw), lambda i, j: (i, 0, j))],
        out_specs=pl.BlockSpec((1, C, 1), lambda i, j: (i, 0, 0)),
        compiler_params=compiler(dimension_semantics=("parallel", "arbitrary")),
    )(x_flat)

    # Tiny ECA conv + sigmoid on the (B, C) means in plain JAX (a few k FLOPs).
    pad = (k - 1) // 2
    padded = jnp.pad(pooled[:, :, 0], ((0, 0), (pad, pad)))
    conv = bias[0]
    for j in range(k):
        conv = conv + w[j] * padded[:, j:j + C]
    gate = jax.nn.sigmoid(conv).astype(x.dtype)[:, :, None]         # (B, C, 1)

    # Pass 2: lane-dense elementwise rescale out = x * gate.
    out = pl.pallas_call(
        _eca_scale_kernel,
        out_shape=jax.ShapeDtypeStruct((B, C, HW), x.dtype),
        grid=grid,
        in_specs=[
            pl.BlockSpec((1, C, thw), lambda i, j: (i, 0, j)),
            pl.BlockSpec((1, C, 1), lambda i, j: (i, 0, 0)),
        ],
        out_specs=pl.BlockSpec((1, C, thw), lambda i, j: (i, 0, j)),
        compiler_params=compiler(dimension_semantics=("parallel", "parallel")),
    )(x_flat, gate)
    return out.reshape(B, C, H, W)


# ---------------------------------------------------------------------------
# Pure-JAX reference of the PyTorch ECAAttention forward.
# ---------------------------------------------------------------------------
def _reference(x, conv_w, conv_b):
    B, C, H, W = x.shape
    w = jnp.asarray(conv_w, jnp.float32).reshape(-1)
    k = w.shape[0]
    pad = (k - 1) // 2
    pooled = jnp.mean(x.astype(jnp.float32), axis=(2, 3))           # (B, C)
    padded = jnp.pad(pooled, ((0, 0), (pad, pad)))
    conv = sum(w[j] * padded[:, j:j + C] for j in range(k))
    conv = conv + jnp.asarray(conv_b, jnp.float32).reshape(())
    gate = jax.nn.sigmoid(conv)
    return (x.astype(jnp.float32) * gate[:, :, None, None]).astype(x.dtype)


if __name__ == "__main__":
    B, C, H, W = 2, 64, 16, 16
    kernel_size = 3

    key = jax.random.PRNGKey(0)
    kx, kw, kb = jax.random.split(key, 3)
    x = jax.random.normal(kx, (B, C, H, W), dtype=jnp.float32)
    conv_w = jax.random.normal(kw, (1, 1, kernel_size), dtype=jnp.float32) * 0.5
    conv_b = jax.random.normal(kb, (1,), dtype=jnp.float32) * 0.1

    ref = _reference(x, conv_w, conv_b)

    # Fused single-pass path (the common case: the (C, HW) slab fits VMEM).
    out_fused = jax.block_until_ready(jax.jit(eca_attention)(x, conv_w, conv_b))
    assert out_fused.shape == (B, C, H, W)
    assert jnp.allclose(out_fused, ref, atol=1e-5, rtol=1e-5), float(
        jnp.max(jnp.abs(out_fused - ref)))

    # Two-pass fallback path (used when the slab exceeds the VMEM budget).
    two_pass = jax.jit(functools.partial(eca_attention, force_two_pass=True))
    out_tp = jax.block_until_ready(two_pass(x, conv_w, conv_b))
    assert jnp.allclose(out_tp, ref, atol=1e-5, rtol=1e-5), float(
        jnp.max(jnp.abs(out_tp - ref)))

    print("KERNEL_OK")
</pallas_src>

<mosaic_0001>
module attributes {stable_mosaic.version = 11 : i64} {
  func.func @_eca_fused_kernel(%arg0: i32, %arg1: memref<3xf32, #tpu.memory_space<smem>>, %arg2: memref<1xf32, #tpu.memory_space<smem>>, %arg3: memref<1x64x256xf32, #tpu.memory_space<vmem>>, %arg4: memref<1x64x256xf32, #tpu.memory_space<vmem>>) attributes {dimension_semantics = [#tpu.dimension_semantics<parallel>], iteration_bounds = array<i64: 2>, scalar_prefetch = 0 : i64, scratch_operands = 0 : i64, tpu.core_type = #tpu.core_type<tc>, window_params = [{transform_indices = @transform_0, window_bounds = array<i64: 3>}, {transform_indices = @transform_1, window_bounds = array<i64: 1>}, {transform_indices = @transform_2, window_bounds = array<i64: 1, 64, 256>}, {transform_indices = @transform_3, window_bounds = array<i64: 1, 64, 256>}]} {
    %c0 = arith.constant 0 : index
    %c0_0 = arith.constant 0 : index
    %c0_1 = arith.constant 0 : index
    %0 = vector.load %arg3[%c0, %c0_0, %c0_1] : memref<1x64x256xf32, #tpu.memory_space<vmem>>, vector<1x64x256xf32>
    %cst = arith.constant dense<0.000000e+00> : vector<1x64xf32>
    %1 = vector.multi_reduction <add>, %0, %cst [2] : vector<1x64x256xf32> to vector<1x64xf32>
    %2 = vector.shape_cast %1 : vector<1x64xf32> to vector<1x64x1xf32>
    %cst_2 = arith.constant 3.906250e-03 : f32
    %3 = vector.broadcast %cst_2 : f32 to vector<1x64x1xf32>
    %4 = arith.mulf %2, %3 : vector<1x64x1xf32>
    %cst_3 = arith.constant 0.000000e+00 : f32
    %5 = vector.broadcast %cst_3 : f32 to vector<1x64x1xf32>
    %6 = tpu.iota {dimensions = array<i32: 1>} : vector<1x64x1xi32>
    %c1_i32 = arith.constant 1 : i32
    %7 = tpu.dynamic_rotate %4 by %c1_i32 dim 1 : vector<1x64x1xf32>, i32 -> vector<1x64x1xf32>
    %c-1_i32 = arith.constant -1 : i32
    %8 = vector.broadcast %c-1_i32 : i32 to vector<1x64x1xi32>
    %9 = arith.addi %6, %8 : vector<1x64x1xi32>
    %c0_i32 = arith.constant 0 : i32
    %10 = vector.broadcast %c0_i32 : i32 to vector<1x64x1xi32>
    %11 = arith.cmpi sge, %9, %10 : vector<1x64x1xi32>
    %c-1_i32_4 = arith.constant -1 : i32
    %12 = vector.broadcast %c-1_i32_4 : i32 to vector<1x64x1xi32>
    %13 = arith.addi %6, %12 : vector<1x64x1xi32>
    %c64_i32 = arith.constant 64 : i32
    %14 = vector.broadcast %c64_i32 : i32 to vector<1x64x1xi32>
    %15 = arith.cmpi slt, %13, %14 : vector<1x64x1xi32>
    %16 = arith.andi %11, %15 : vector<1x64x1xi1>
    %c0_5 = arith.constant 0 : index
    %17 = memref.load %arg1[%c0_5] : memref<3xf32, #tpu.memory_space<smem>>
    %cst_6 = arith.constant 0.000000e+00 : f32
    %18 = vector.broadcast %cst_6 : f32 to vector<1x64x1xf32>
    %19 = arith.select %16, %7, %18 : vector<1x64x1xi1>, vector<1x64x1xf32>
    %20 = vector.broadcast %17 : f32 to vector<1x64x1xf32>
    %21 = arith.mulf %20, %19 : vector<1x64x1xf32>
    %22 = arith.addf %5, %21 : vector<1x64x1xf32>
    %c1 = arith.constant 1 : index
    %23 = memref.load %arg1[%c1] : memref<3xf32, #tpu.memory_space<smem>>
    %24 = vector.broadcast %23 : f32 to vector<1x64x1xf32>
    %25 = arith.mulf %24, %4 : vector<1x64x1xf32>
    %26 = arith.addf %22, %25 : vector<1x64x1xf32>
    %c63_i32 = arith.constant 63 : i32
    %27 = tpu.dynamic_rotate %4 by %c63_i32 dim 1 : vector<1x64x1xf32>, i32 -> vector<1x64x1xf32>
    %c1_i32_7 = arith.constant 1 : i32
    %28 = vector.broadcast %c1_i32_7 : i32 to vector<1x64x1xi32>
    %29 = arith.addi %6, %28 : vector<1x64x1xi32>
    %c0_i32_8 = arith.constant 0 : i32
    %30 = vector.broadcast %c0_i32_8 : i32 to vector<1x64x1xi32>
    %31 = arith.cmpi sge, %29, %30 : vector<1x64x1xi32>
    %c1_i32_9 = arith.constant 1 : i32
    %32 = vector.broadcast %c1_i32_9 : i32 to vector<1x64x1xi32>
    %33 = arith.addi %6, %32 : vector<1x64x1xi32>
    %c64_i32_10 = arith.constant 64 : i32
    %34 = vector.broadcast %c64_i32_10 : i32 to vector<1x64x1xi32>
    %35 = arith.cmpi slt, %33, %34 : vector<1x64x1xi32>
    %36 = arith.andi %31, %35 : vector<1x64x1xi1>
    %c2 = arith.constant 2 : index
    %37 = memref.load %arg1[%c2] : memref<3xf32, #tpu.memory_space<smem>>
    %cst_11 = arith.constant 0.000000e+00 : f32
    %38 = vector.broadcast %cst_11 : f32 to vector<1x64x1xf32>
    %39 = arith.select %36, %27, %38 : vector<1x64x1xi1>, vector<1x64x1xf32>
    %40 = vector.broadcast %37 : f32 to vector<1x64x1xf32>
    %41 = arith.mulf %40, %39 : vector<1x64x1xf32>
    %42 = arith.addf %26, %41 : vector<1x64x1xf32>
    %c0_12 = arith.constant 0 : index
    %43 = memref.load %arg2[%c0_12] : memref<1xf32, #tpu.memory_space<smem>>
    %44 = vector.broadcast %43 : f32 to vector<1x64x1xf32>
    %45 = arith.addf %42, %44 : vector<1x64x1xf32>
    %46 = arith.negf %45 : vector<1x64x1xf32>
    %47 = math.exp %46 : vector<1x64x1xf32>
    %cst_13 = arith.constant 1.000000e+00 : f32
    %48 = vector.broadcast %cst_13 : f32 to vector<1x64x1xf32>
    %49 = arith.addf %48, %47 : vector<1x64x1xf32>
    %50 = arith.divf %48, %49 : vector<1x64x1xf32>
    %c0_14 = arith.constant 0 : index
    %c0_15 = arith.constant 0 : index
    %c0_16 = arith.constant 0 : index
    %51 = vector.load %arg3[%c0_14, %c0_15, %c0_16] : memref<1x64x256xf32, #tpu.memory_space<vmem>>, vector<1x64x256xf32>
    %52 = vector.broadcast %50 : vector<1x64x1xf32> to vector<1x64x256xf32>
    %53 = arith.mulf %51, %52 : vector<1x64x256xf32>
    %c0_17 = arith.constant 0 : index
    %c0_18 = arith.constant 0 : index
    %c0_19 = arith.constant 0 : index
    %54 = vector.load %arg4[%c0_17, %c0_18, %c0_19] : memref<1x64x256xf32, #tpu.memory_space<vmem>>, vector<1x64x256xf32>
    tpu.vector_store %arg4[%c0_17, %c0_18, %c0_19], %53 {strides = array<i32>} : memref<1x64x256xf32, #tpu.memory_space<vmem>>, vector<1x64x256xf32>,
    return
  }
  func.func @transform_0(%arg0: i32) -> i32 {
    %c0_i32 = arith.constant 0 : i32
    %c0_i32_0 = arith.constant 0 : i32
    return %c0_i32 : i32
  }
  func.func @transform_1(%arg0: i32) -> i32 {
    %c0_i32 = arith.constant 0 : i32
    %c0_i32_0 = arith.constant 0 : i32
    return %c0_i32 : i32
  }
  func.func @transform_2(%arg0: i32) -> (i32, i32, i32) {
    %c0_i32 = arith.constant 0 : i32
    %c0_i32_0 = arith.constant 0 : i32
    %c0_i32_1 = arith.constant 0 : i32
    return %arg0, %c0_i32, %c0_i32_0 : i32, i32, i32
  }
  func.func @transform_3(%arg0: i32) -> (i32, i32, i32) {
    %c0_i32 = arith.constant 0 : i32
    %c0_i32_0 = arith.constant 0 : i32
    %c0_i32_1 = arith.constant 0 : i32
    return %arg0, %c0_i32, %c0_i32_0 : i32, i32, i32
  }
}

</mosaic_0001>

<bundles_post_ra>
// kernel: eca_attention.1
= control target key start
LH: loop header
LB: loop body
LE: loop exit
PB: predicated region body
PF: predicated region fallthrough
CT: control target
= control target key end

     0   :  { %s953_s0 = inlined_call_operand.vmem [shape: f32[3], index: 0, kind: input, shape index: {}]   ;;  %s954_s1 = inlined_call_operand.<no memory space> [shape: f32[1], index: 1, kind: input, shape index: {}]   ;;  %s955_s2 = inlined_call_operand.vmem [shape: f32[2,64,256], index: 2, kind: input, shape index: {}]   ;;  %s956_s3 = inlined_call_operand.vmem [shape: f32[2,64,256], index: 3, kind: output, shape index: {}]  }
   0x1   :  { %8 = sst [smem:[#allocation2]] %s954_s1 }
   0x2   :  { %9 = vsyncpa [#allocation4], 0  ;;  %s739_s14 = smov 0  }
   0x3 LB: > { %s608_s15 = sadd.s32 4294967295, %s712_s14   ;;  %p610_p0 = scmp.ge.s32.totalorder %s712_s14, 1  ;;  %s712_s14 = sphi %s739_s14, %s15_s14  }
   0x4   : > { %p114_p1 = scmp.lt.s32.totalorder %s712_s14, 3  ;;  %s127_s18 = sshll.u32 %s953_s0, 4  ;;  %s128_s18 = int_to_ptr.vmem [resolvable:$true] %s127_s18 }
   0x5   : > { %p641_p3 = scmp.eq.s32.totalorder %s608_s15, 0  ;;  %s687_s19 = scalar_lea.vmem %s128_s18, 16 }
   0x6   : > { %p750_p2 = pnand %p610_p0, %p114_p1  ;;  %p688_p6 = scmp.ne.s32.totalorder %s128_s18, %s687_s19 }
   0x7   : > { %p695_p10 = scmp.lt.s32.totalorder %s128_s18, %s128_s18  ;;  %p696_p11 = scmp.lt.s32.totalorder %s687_s19, %s687_s19 }
   0x8   : > { %p637_p4 = pneg %p750_p2 }
   0x9   : > { %p697_p12 = por %p696_p11, %p695_p10 }
   0xa   : > { %p638_p5 = pnand %p641_p3, %p637_p4 }
   0xc   : > { %p689_p7 = pneg %p638_p5 }
   0xe   : > { %p690_p8 = pnand %p689_p7, %p688_p6 }
  0x10   : > { %p691_p9 = pneg %p690_p8 }
  0x12   : > { %p698_p13 = pnand %p697_p12, %p691_p9 }
  0x14   : > { %701 = shalt.err (!%p698_p13)
}
  0x15   : > { %s714_s20 = smov [#allocation3]   ;;  %151 = sbr.rel (%p750_p2) target bundleno = 383 (0x17f), region = 32 }
  0x16   : > { %640 = dma.vmem_to_smem (!%p638_p5), %s128_s18, 16, %s714_s20, [#allocation4]  }
  0x1c   : > { %707 = dma.done.wait (%p641_p3), [#allocation4], 16  }
  0x1d   : > { %709 = vsyncadd (%p641_p3), [#allocation4], 4294967280 }
  0x1e   : > { %157 = sfence }
  0x1f   : > { %p176_p0 = scmp.lt.s32.totalorder %s608_s15, 1  ;;  %v715_v24 = vmov 0   ;;  %v234_v25 = vlaneseq  ;;  %s292_s25 = sld [smem:[#allocation3]] }
  0x20   : > { %654 = vset.pattern.permute.xlu1 %v715_v24  ;;  %653 = vset.pattern.permute.xlu0 %v715_v24  ;;  %s619_s26 = sld [smem:[#allocation3 + $0x1]]  ;;  %s620_s27 = sld [smem:[#allocation3 + $0x2]] }
  0x21   : > { %s959_s15 = smov (!%p176_p0, %s608_s15), 1  ;;  %v817_v26 = vshrl.u32 %v234_v25, 7  ;;  %s411_s28 = sld [smem:[#allocation2]] }
  0x22   : > { %s631_s21 = sshll.u32 %s959_s15, 7 }
  0x23   : > { %s180_s24 = scalar_lea.vmem %s955_s2, %s631_s21  ;;  %vm251_vm0 = vcmp.lt.s32.totalorder %v817_v26, 1  ;;  %v242_v35 = vadd.s32 56, %v817_v26  ;;  %v260_v36 = vadd.s32 4294967295, %v817_v26  ;;  %vm344_vm1 = vcmp.lt.s32.totalorder %v817_v26, 7  ;;  %s916_s4 = scalar_lea.vmem %s956_s3, %s631_s21 }
  0x24   : > { %v769_v0 = vld [vmem:[%s180_s24 + $0x10] sm:$0xff]  ;;  %v771_v1 = vld [vmem:[%s180_s24 + $0x18] sm:$0xff]  ;;  %v773_v2 = vld [vmem:[%s180_s24] sm:$0xff] }
  0x25   : > { %v205_v3 = vadd.f32 %v771_v1, %v769_v0  ;;  %v777_v4 = vld [vmem:[%s180_s24 + $0x8] sm:$0xff]  ;;  %v779_v5 = vld [vmem:[%s180_s24 + $0x20] sm:$0xff]  ;;  %v785_v8 = vld [vmem:[%s180_s24 + $0x70] sm:$0xff]  ;;  %v820_v32 = vstv %s292_s25  ;;  %vm268_vm2 = vcmp.ge.s32.totalorder %v260_v36, 0  ;;  %v834_v48 = vadd.s32 1, %v242_v35 }
  0x26   : > { %v781_v6 = vld [vmem:[%s180_s24 + $0x28] sm:$0xff]  ;;  %v202_v7 = vadd.f32 %v777_v4, %v773_v2  ;;  %v787_v9 = vld [vmem:[%s180_s24 + $0x78] sm:$0xff]  ;;  %v793_v12 = vld [vmem:[%s180_s24 + $0x40] sm:$0xff]  ;;  %v824_v41 = vstv %s619_s26 }
  0x27   : > { %206 = vadd.xlane.f32.xlu1 %v205_v3  ;;  %v208_v10 = vadd.f32 %v781_v6, %v779_v5  ;;  %v223_v11 = vadd.f32 %v787_v9, %v785_v8  ;;  %v795_v13 = vld [vmem:[%s180_s24 + $0x48] sm:$0xff]  ;;  %v797_v14 = vld [vmem:[%s180_s24 + $0x30] sm:$0xff]  ;;  %v799_v15 = vld [vmem:[%s180_s24 + $0x38] sm:$0xff]  ;;  %v831_v44 = vstv %s620_s27  ;;  %vm376_vm3 = vcmp.lt.s32.totalorder %v834_v48, 64 }
  0x28   : > { %203 = vadd.xlane.f32.xlu0 %v202_v7  ;;  %v214_v16 = vadd.f32 %v795_v13, %v793_v12  ;;  %v211_v17 = vadd.f32 %v799_v15, %v797_v14  ;;  %v805_v18 = vld [vmem:[%s180_s24 + $0x60] sm:$0xff]  ;;  %v807_v19 = vld [vmem:[%s180_s24 + $0x68] sm:$0xff]  ;;  %v809_v20 = vld [vmem:[%s180_s24 + $0x50] sm:$0xff]  ;;  %v844_v56 = vstv %s411_s28 }
  0x29   : > { %v811_v21 = vld [vmem:[%s180_s24 + $0x58] sm:$0xff]  ;;  %v220_v22 = vadd.f32 %v807_v19, %v805_v18 }
  0x2a   : > { %v217_v23 = vadd.f32 %v811_v21, %v809_v20 }
  0x2b   : > { %209 = vadd.xlane.f32.xlu1 %v208_v10 }
  0x2c   : > { %224 = vadd.xlane.f32.xlu0 %v223_v11 }
  0x2f   : > { %215 = vadd.xlane.f32.xlu1 %v214_v16 }
  0x30   : > { %212 = vadd.xlane.f32.xlu0 %v211_v17 }
  0x33   : > { %221 = vadd.xlane.f32.xlu1 %v220_v22 }
  0x34   : > { %218 = vadd.xlane.f32.xlu0 %v217_v23 }
  0xb4   : > { %v207_v27 = vpop.xlane.xlu1 %206 }
  0xb5   : > { %v227_v28 = vmul.f32 0.00390625, %v207_v27  ;;  %v204_v29 = vpop.xlane.xlu0 %203 }
  0xb6   : > { %v226_v30 = vmul.f32 0.00390625, %v204_v29 }
  0xb7   : > { %v244_v31 = vrot.slane %v227_v28, 7  ;;  %v337_v37 = vrot.slane %v227_v28, 1  ;;  %v321_v51 = vmul.f32 %v824_v41, %v227_v28 }
  0xb8   : > { %v243_v33 = vrot.slane %v226_v30, 7  ;;  %v210_v34 = vpop.xlane.xlu1 %209  ;;  %v336_v38 = vrot.slane %v226_v30, 1  ;;  %v320_v3 = vmul.f32 %v824_v41, %v226_v30 }
  0xb9   : > { %v228_v39 = vmul.f32 0.00390625, %v210_v34  ;;  %v225_v40 = vpop.xlane.xlu0 %224 }
  0xba   : > { %v258_v42 = vsel %vm251_vm0, %v243_v33, %v244_v31  ;;  %v829_v43 = vmul.f32 0.00390625, %v225_v40  ;;  %v351_v52 = vsel %vm344_vm1, %v336_v38, %v337_v37 }
  0xbb   : > { %v303_v45 = vmul.f32 %v820_v32, %v258_v42  ;;  %v245_v46 = vrot.slane %v228_v39, 7  ;;  %v338_v47 = vrot.slane %v228_v39, 1  ;;  %v395_v7 = vmul.f32 %v831_v44, %v351_v52 }
  0xbc   : > { %v250_v49 = vrot.slane %v829_v43, 7  ;;  %v216_v50 = vpop.xlane.xlu1 %215  ;;  %v343_v59 = vrot.slane %v829_v43, 1  ;;  %v322_v10 = vmul.f32 %v824_v41, %v228_v39  ;;  %v327_v27 = vmul.f32 %v824_v41, %v829_v43 }
  0xbd   : > { %v257_v53 = vsel %vm251_vm0, %v244_v31, %v245_v46  ;;  %v842_v54 = vmul.f32 0.00390625, %v216_v50  ;;  %v213_v55 = vpop.xlane.xlu0 %212  ;;  %v350_v57 = vsel %vm344_vm1, %v337_v37, %v338_v47  ;;  %v329_v60 = vadd.f32 %v321_v51, %v303_v45 }
  0xbe   : > { %v259_v58 = vsel %vm251_vm0, %v250_v49, %v243_v33  ;;  %v304_v61 = vmul.f32 %v820_v32, %v257_v53  ;;  %v396_v62 = vmul.f32 %v831_v44, %v350_v57  ;;  %v229_v23 = vmul.f32 0.00390625, %v213_v55 }
  0xbf   : > { %v293_v63 = vsel %vm268_vm2, %v259_v58, 0.0  ;;  %v340_v22 = vrot.slane %v842_v54, 1  ;;  %v352_v29 = vsel %vm344_vm1, %v343_v59, %v336_v38  ;;  %v247_v30 = vrot.slane %v842_v54, 7 }
  0xc0   : > { %v302_v11 = vmul.f32 %v820_v32, %v293_v63  ;;  %v222_v16 = vpop.xlane.xlu1 %221  ;;  %v404_v17 = vadd.f32 %v396_v62, %v329_v60  ;;  %v330_v31 = vadd.f32 %v322_v10, %v304_v61  ;;  %v246_v34 = vrot.slane %v229_v23, 7 }
  0xc1   : > { %v232_v24 = vmul.f32 0.00390625, %v222_v16  ;;  %v219_v25 = vpop.xlane.xlu0 %218  ;;  %v339_v35 = vrot.slane %v229_v23, 1  ;;  %v323_v37 = vmul.f32 %v824_v41, %v229_v23  ;;  %v324_v55 = vmul.f32 %v824_v41, %v842_v54 }
  0xc2   : > { %v328_v28 = vadd.f32 %v320_v3, %v302_v11  ;;  %v414_v33 = vadd.f32 %v844_v56, %v404_v17  ;;  %v231_v40 = vmul.f32 0.00390625, %v219_v25  ;;  %v256_v43 = vsel %vm251_vm0, %v245_v46, %v246_v34 }
  0xc3   : > { %v249_v39 = vrot.slane %v232_v24, 7  ;;  %v348_v45 = vsel %vm344_vm1, %v339_v35, %v340_v22  ;;  %v342_v38 = vrot.slane %v232_v24, 1  ;;  %v255_v51 = vsel %vm251_vm0, %v246_v34, %v247_v30 }
  0xc4   : > { %v403_v36 = vadd.f32 %v395_v7, %v328_v28  ;;  %v622_v42 = vmul.f32 -1.442695, %v414_v33  ;;  %v305_v52 = vmul.f32 %v820_v32, %v256_v43  ;;  %v349_v53 = vsel %vm344_vm1, %v338_v47, %v339_v35 }
  0xc5   : > { %v397_v46 = vmul.f32 %v831_v44, %v349_v53  ;;  %v252_v57 = vsel %vm251_vm0, %v249_v39, %v250_v49  ;;  %v398_v61 = vmul.f32 %v831_v44, %v348_v45  ;;  %v326_v62 = vmul.f32 %v824_v41, %v232_v24 }
  0xc6   : > { %v413_v50 = vadd.f32 %v844_v56, %v403_v36  ;;  %655 = vpow2.f32 %v622_v42  ;;  %v331_v60 = vadd.f32 %v323_v37, %v305_v52  ;;  %v306_v63 = vmul.f32 %v820_v32, %v255_v51 }
  0xc7   : > { %v405_v3 = vadd.f32 %v397_v46, %v330_v31  ;;  %v309_v47 = vmul.f32 %v820_v32, %v252_v57  ;;  %v248_v7 = vrot.slane %v231_v40, 7  ;;  %v345_v54 = vsel %vm344_vm1, %v342_v38, %v343_v59 }
  0xc8   : > { %v621_v58 = vmul.f32 -1.442695, %v413_v50  ;;  %v406_v10 = vadd.f32 %v398_v61, %v331_v60  ;;  %v325_v11 = vmul.f32 %v824_v41, %v231_v40  ;;  %v341_v23 = vrot.slane %v231_v40, 1 }
  0xc9   : > { %v415_v49 = vadd.f32 %v844_v56, %v405_v3  ;;  %v253_v16 = vsel %vm251_vm0, %v248_v7, %v249_v39  ;;  %v254_v17 = vsel %vm251_vm0, %v247_v30, %v248_v7  ;;  %v393_v24 = vsel %vm376_vm3, %v352_v29, 0.0 }
  0xca   : > { %657 = vpow2.f32 %v621_v58  ;;  %v416_v25 = vadd.f32 %v844_v56, %v406_v10  ;;  %v307_v28 = vmul.f32 %v820_v32, %v254_v17  ;;  %v308_v59 = vmul.f32 %v820_v32, %v253_v16 }
  0xcb   : > { %v332_v31 = vadd.f32 %v324_v55, %v306_v63  ;;  %v623_v41 = vmul.f32 -1.442695, %v415_v49  ;;  %v346_v33 = vsel %vm344_vm1, %v341_v23, %v342_v38  ;;  %v347_v34 = vsel %vm344_vm1, %v340_v22, %v341_v23 }
  0xcc   : > { %v624_v35 = vmul.f32 -1.442695, %v416_v25  ;;  %v401_v30 = vmul.f32 %v831_v44, %v345_v54  ;;  %v333_v36 = vadd.f32 %v325_v11, %v307_v28  ;;  %v334_v48 = vadd.f32 %v326_v62, %v308_v59 }
  0xcd   : > { %659 = vpow2.f32 %v623_v41  ;;  %v335_v29 = vadd.f32 %v327_v27, %v309_v47  ;;  %v399_v37 = vmul.f32 %v831_v44, %v347_v34  ;;  %v400_v39 = vmul.f32 %v831_v44, %v346_v33 }
  0xce   : > { %661 = vpow2.f32 %v624_v35  ;;  %v409_v32 = vadd.f32 %v401_v30, %v334_v48  ;;  %v402_v42 = vmul.f32 %v831_v44, %v393_v24 }
  0xcf   : > { %v407_v43 = vadd.f32 %v399_v37, %v332_v31  ;;  %v408_v45 = vadd.f32 %v400_v39, %v333_v36 }
  0xd0   : > { %v656_v40 = vpop.eup %655  ;;  %v410_v22 = vadd.f32 %v402_v42, %v335_v29  ;;  %v419_v51 = vadd.f32 %v844_v56, %v409_v32 }
  0xd1   : > { %v446_v26 = vadd.f32 1.0, %v656_v40  ;;  %v417_v38 = vadd.f32 %v844_v56, %v407_v43  ;;  %v418_v50 = vadd.f32 %v844_v56, %v408_v45 }
  0xd2   : > { %v420_v46 = vadd.f32 %v844_v56, %v410_v22  ;;  %v627_v57 = vmul.f32 -1.442695, %v419_v51 }
  0xd3   : > { %663 = vrcp.f32 %v446_v26  ;;  %v625_v53 = vmul.f32 -1.442695, %v417_v38  ;;  %v626_v55 = vmul.f32 -1.442695, %v418_v50 }
  0xd4   : > { %v658_v27 = vpop.eup %657  ;;  %v628_v61 = vmul.f32 -1.442695, %v420_v46 }
  0xd5   : > { %v445_v52 = vadd.f32 1.0, %v658_v27 }
  0xd7   : > { %665 = vrcp.f32 %v445_v52  ;;  %v660_v44 = vpop.eup %659 }
  0xd8   : > { %667 = vpow2.f32 %v625_v53  ;;  %v662_v58 = vpop.eup %661  ;;  %v447_v60 = vadd.f32 1.0, %v660_v44 }
  0xd9   : > { %669 = vpow2.f32 %v626_v55  ;;  %v448_v62 = vadd.f32 1.0, %v662_v58 }
  0xda   : > { %671 = vpow2.f32 %v627_v57 }
  0xdb   : > { %673 = vrcp.f32 %v447_v60 }
  0xdc   : > { %675 = vpow2.f32 %v628_v61 }
  0xdd   : > { %v664_v63 = vpop.eup %663  ;;  %677 = vrcp.f32 %v448_v62 }
  0xde   : > { %476 = vperm.xlu1 %654, %v664_v63  }
  0xe1   : > { %v666_v3 = vpop.eup %665 }
  0xe2   : > { %v668_v47 = vpop.eup %667  ;;  %471 = vperm.xlu0 %653, %v666_v3  }
  0xe3   : > { %v670_v7 = vpop.eup %669  ;;  %v449_v10 = vadd.f32 1.0, %v668_v47 }
  0xe4   : > { %v672_v56 = vpop.eup %671  ;;  %v450_v54 = vadd.f32 1.0, %v670_v7 }
  0xe5   : > { %679 = vrcp.f32 %v449_v10  ;;  %v674_v11 = vpop.eup %673  ;;  %v451_v16 = vadd.f32 1.0, %v672_v56 }
  0xe6   : > { %481 = vperm.xlu1 %654, %v674_v11   ;;  %v676_v49 = vpop.eup %675  ;;  %681 = vrcp.f32 %v450_v54 }
  0xe7   : > { %v678_v17 = vpop.eup %677  ;;  %v452_v23 = vadd.f32 1.0, %v676_v49  ;;  %683 = vrcp.f32 %v451_v16 }
  0xe9   : > { %685 = vrcp.f32 %v452_v23 }
  0xea   : > { %486 = vperm.xlu1 %654, %v678_v17  }
  0xef   : > { %v680_v24 = vpop.eup %679 }
  0xf0   : > { %491 = vperm.xlu1 %654, %v680_v24   ;;  %v682_v25 = vpop.eup %681 }
  0xf1   : > { %v684_v28 = vpop.eup %683 }
  0xf3   : > { %v686_v59 = vpop.eup %685 }
  0xf4   : > { %496 = vperm.xlu1 %654, %v682_v25  }
  0xf8   : > { %501 = vperm.xlu1 %654, %v684_v28  }
  0xfc   : > { %506 = vperm.xlu1 %654, %v686_v59  }
 0x15d   : > { %v477_v31 = vpop.permute.xlu1 %476 }
 0x15e   : > { %v511_v41 = vmul.f32 %v477_v31, %v769_v0  ;;  %v512_v33 = vmul.f32 %v477_v31, %v771_v1 }
 0x160   : > { %527 = vst [vmem:[%s916_s4 + $0x10] sm:$0xff] %v511_v41  ;;  %528 = vst [vmem:[%s916_s4 + $0x18] sm:$0xff] %v512_v33 }
 0x161   : > { %v472_v34 = vpop.permute.xlu0 %471 }
 0x162   : > { %v509_v35 = vmul.f32 %v472_v34, %v773_v2  ;;  %v510_v30 = vmul.f32 %v472_v34, %v777_v4 }
 0x164   : > { %525 = vst [vmem:[%s916_s4] sm:$0xff] %v509_v35  ;;  %526 = vst [vmem:[%s916_s4 + $0x8] sm:$0xff] %v510_v30 }
 0x165   : > { %v482_v36 = vpop.permute.xlu1 %481 }
 0x166   : > { %v513_v48 = vmul.f32 %v482_v36, %v779_v5  ;;  %v514_v0 = vmul.f32 %v482_v36, %v781_v6 }
 0x168   : > { %529 = vst [vmem:[%s916_s4 + $0x20] sm:$0xff] %v513_v48  ;;  %530 = vst [vmem:[%s916_s4 + $0x28] sm:$0xff] %v514_v0 }
 0x169   : > { %v487_v1 = vpop.permute.xlu1 %486 }
 0x16a   : > { %v515_v29 = vmul.f32 %v487_v1, %v797_v14  ;;  %v516_v2 = vmul.f32 %v487_v1, %v799_v15 }
 0x16c   : > { %531 = vst [vmem:[%s916_s4 + $0x30] sm:$0xff] %v515_v29  ;;  %532 = vst [vmem:[%s916_s4 + $0x38] sm:$0xff] %v516_v2 }
 0x16f   : > { %v492_v4 = vpop.permute.xlu1 %491 }
 0x170   : > { %v517_v37 = vmul.f32 %v492_v4, %v793_v12  ;;  %v518_v5 = vmul.f32 %v492_v4, %v795_v13 }
 0x172   : > { %533 = vst [vmem:[%s916_s4 + $0x40] sm:$0xff] %v517_v37  ;;  %534 = vst [vmem:[%s916_s4 + $0x48] sm:$0xff] %v518_v5 }
 0x173   : > { %v497_v6 = vpop.permute.xlu1 %496 }
 0x174   : > { %v519_v39 = vmul.f32 %v497_v6, %v809_v20  ;;  %v520_v14 = vmul.f32 %v497_v6, %v811_v21 }
 0x176   : > { %535 = vst [vmem:[%s916_s4 + $0x50] sm:$0xff] %v519_v39  ;;  %536 = vst [vmem:[%s916_s4 + $0x58] sm:$0xff] %v520_v14 }
 0x177   : > { %v502_v15 = vpop.permute.xlu1 %501 }
 0x178   : > { %v521_v32 = vmul.f32 %v502_v15, %v805_v18  ;;  %v522_v40 = vmul.f32 %v502_v15, %v807_v19 }
 0x17a   : > { %537 = vst [vmem:[%s916_s4 + $0x60] sm:$0xff] %v521_v32  ;;  %538 = vst [vmem:[%s916_s4 + $0x68] sm:$0xff] %v522_v40 }
 0x17b   : > { %v507_v12 = vpop.permute.xlu1 %506 }
 0x17c   : > { %v523_v13 = vmul.f32 %v507_v12, %v785_v8  ;;  %v524_v42 = vmul.f32 %v507_v12, %v787_v9 }
 0x17e   : > { %539 = vst [vmem:[%s916_s4 + $0x70] sm:$0xff] %v523_v13  ;;  %540 = vst [vmem:[%s916_s4 + $0x78] sm:$0xff] %v524_v42 }
 0x17f PF: > { %s15_s14 = sadd.s32 1, %s712_s14  }
 0x180   : > { %p12_p1 = scmp.ge.s32.totalorder %s15_s14, 4  }
 0x182   :  { %14 = sbr.rel (!%p12_p1) target bundleno = 3 (0x3), region = 67 }
 0x189   :  { %562 = vsyncpa [#allocation4], 1 }
 0x18a   :  { %564 = vsyncpa [#allocation4 + $0x1], 1 }

</bundles_post_ra>
